<compile_context>
chip_gen: v5e
topology: v5e:2x2
jax: 0.10.0
libtpu: 0.0.40
codegen_flags: <defaults>
</compile_context>

<pallas_src>
import jax
import jax.numpy as jnp
from jax.experimental import pallas as pl
from jax.experimental.pallas import tpu as pltpu

_LANE = 128
_TARGET_STEP_BYTES = 8 * 1024 * 1024   # ~8 MiB of HBM traffic per grid step


def _crelu_kernel(x_ref, o_ref):
    # x_ref: (B, S, T) tile; o_ref: (B, 2, S, T) tile.
    # Plane 0 = relu(x), plane 1 = relu(-x).  (Keeping the explicit second
    # maximum preserves exact semantics for +/-inf; this kernel is HBM-bound,
    # so the extra VALU op is free.)
    x = x_ref[...]
    o_ref[:, 0] = jnp.maximum(x, 0).astype(o_ref.dtype)
    o_ref[:, 1] = jnp.maximum(-x, 0).astype(o_ref.dtype)


def _vmem_budget_bytes():
    """Generation-aware VMEM budget for this kernel's pipeline buffers.

    Use at most half of physical VMEM (128 MiB on v5e/v6e, 64 MiB on v7x),
    capped at 64 MiB — far more than a mem-bound elementwise op ever needs.
    """
    cap = 64 * 1024 * 1024
    try:
        info = pltpu.get_tpu_info()
        cap = int(getattr(info, "vmem_capacity_bytes", cap))
    except Exception:
        pass
    return int(min(max(cap // 2, 16 * 1024 * 1024), 64 * 1024 * 1024))


def _largest_aligned_divisor(extent, cap, quantum):
    """Largest multiple of `quantum` dividing `extent`, <= max(cap, quantum).

    Requires extent % quantum == 0.
    """
    t = max(quantum, (min(extent, cap) // quantum) * quantum)
    while extent % t != 0:
        t -= quantum
    return t


def _largest_divisor(n, cap):
    d = max(1, min(n, cap))
    while n % d != 0:
        d -= 1
    return d


def _choose_tiles(n, s, l, itemsize, vmem_budget, target_step_bytes):
    """Pick (batch_block b, lane_tile t) for input blocks (b, s, t) on an
    (n, s, l) array; output blocks are (b, 2, s, t).

    Bytes-based sizing: per-step HBM traffic = 3*b*s*t*itemsize (1x in, 2x out)
    is pushed toward `target_step_bytes`, while the double-buffered pipeline
    footprint (~ 2*in + 2*(2x out) = 6 * b * s_pad * t * itemsize) stays under
    `vmem_budget`.
    """
    sublane = max(8, 32 // max(1, itemsize))          # 8 f32 / 16 bf16 / 32 i8
    s_pad = -(-s // sublane) * sublane                # VMEM rows are sublane-padded

    usable = int(vmem_budget * 0.8)                   # headroom for compiler scratch
    max_block_padded_elems = max(_LANE * s_pad, usable // (6 * itemsize))
    target_block_elems = max(_LANE, target_step_bytes // (3 * itemsize))

    # --- lane tile ---
    if l % _LANE == 0:
        t_cap_vmem = max(_LANE, ((max_block_padded_elems // s_pad) // _LANE) * _LANE)
        t_want = -(-target_block_elems // max(1, s))
        t_cap_tgt = -(-t_want // _LANE) * _LANE
        t = _largest_aligned_divisor(l, min(t_cap_vmem, t_cap_tgt), _LANE)
    else:
        # Lane-sparse full-extent fallback; only hit when neither HW nor C*HW
        # is a multiple of 128 (rare odd spatial sizes, tiny anyway).
        t = l

    # --- batch block (amortizes per-step overhead when C / HW are small) ---
    b_cap_vmem = max(1, max_block_padded_elems // (s_pad * t))
    b_cap_tgt = max(1, -(-target_block_elems // max(1, s * t)))
    b = _largest_divisor(n, min(b_cap_vmem, b_cap_tgt))

    # --- keep >=2 grid steps so both v7x TensorCores get work ---
    if (n // b) * (l // t) < 2:
        if b > 1 and b % 2 == 0:
            b //= 2
        elif l % _LANE == 0 and t % (2 * _LANE) == 0:
            t //= 2
    return b, t


def crelu(x):
    """CReLU for NCHW input: returns concat([relu(x), relu(-x)], axis=1)."""
    N, C, H, W = x.shape
    HW = H * W
    itemsize = jnp.dtype(x.dtype).itemsize

    # Lane-dense layout choice (all are free metadata reshapes):
    #   1) last dim = HW                when HW % 128 == 0
    #   2) last dim = C*HW  (S = 1)     when HW % 128 != 0 but C*HW % 128 == 0
    #   3) full-extent last dim         otherwise (masked tail stores, rare)
    if HW % _LANE == 0:
        S, L = C, HW
    elif (C * HW) % _LANE == 0:
        S, L = 1, C * HW
    else:
        S, L = C, HW
    x3 = x.reshape(N, S, L)

    # TODO(synk): tile the channel axis too if C is ever large enough that a
    # single (sublane-padded) C x 128 block exceeds the VMEM budget.
    budget = _vmem_budget_bytes()
    b_blk, t_l = _choose_tiles(N, S, L, itemsize, budget, _TARGET_STEP_BYTES)
    grid = (N // b_blk, L // t_l)

    out = pl.pallas_call(
        _crelu_kernel,
        out_shape=jax.ShapeDtypeStruct((N, 2, S, L), x.dtype),
        grid_spec=pltpu.PrefetchScalarGridSpec(
            num_scalar_prefetch=0,
            grid=grid,
            in_specs=[
                pl.BlockSpec((b_blk, S, t_l), lambda i, j: (i, 0, j)),
            ],
            out_specs=pl.BlockSpec(
                (b_blk, 2, S, t_l), lambda i, j: (i, 0, 0, j)
            ),
        ),
        compiler_params=pltpu.CompilerParams(
            # Both axes independent -> shard across the 2 TCs on v7x.
            dimension_semantics=("parallel", "parallel"),
            # Explicit, generation-aware scoped-VMEM limit so the big tiles
            # chosen above compile on v5e (16 MiB default) and v6e/v7x alike.
            vmem_limit_bytes=budget,
        ),
        cost_estimate=pl.CostEstimate(
            flops=2 * N * C * HW,
            bytes_accessed=3 * N * C * HW * itemsize,
            transcendentals=0,
        ),
    )(x3)

    # (N, 2, S, L) -> (N, 2C, H, W): contiguous row-major metadata reshape that
    # reproduces the channel-dim concat exactly.
    return out.reshape(N, 2 * C, H, W)


def crelu_ref(x):
    return jnp.concatenate([jnp.maximum(x, 0), jnp.maximum(-x, 0)], axis=1)


def _check(x):
    y = crelu(x)
    jax.block_until_ready(y)
    y_ref = crelu_ref(x)
    assert y.shape == y_ref.shape, (y.shape, y_ref.shape)
    assert jnp.allclose(y, y_ref), "mismatch vs reference"


if __name__ == "__main__":
    key = jax.random.PRNGKey(0)
    ks = jax.random.split(key, 5)

    # Primary case from the spec: (N=2, C=4, H=16, W=16) -> HW=256 lane-dense.
    x = jax.random.normal(ks[0], (2, 4, 16, 16), dtype=jnp.float32)
    y = crelu(x)
    jax.block_until_ready(y)
    y_ref = crelu_ref(x)
    assert y.shape == (2, 8, 16, 16), y.shape
    assert jnp.allclose(y, y_ref), "mismatch vs reference"

    # Larger HW / batch -> exercises lane tiling + batch blocking + 2-step grid.
    _check(jax.random.normal(ks[1], (4, 4, 64, 64), dtype=jnp.float32))

    # HW not lane-aligned but C*HW is -> merged-lane layout (path 2).
    _check(jax.random.normal(ks[2], (2, 2, 8, 8), dtype=jnp.float32))

    # Neither HW nor C*HW lane-aligned -> full-extent fallback (path 3).
    _check(jax.random.normal(ks[3], (2, 4, 5, 7), dtype=jnp.float32))

    # bf16 dtype (16-sublane packing path in the tile chooser).
    _check(jax.random.normal(ks[4], (2, 4, 16, 16), dtype=jnp.bfloat16))

    print("KERNEL_OK")
</pallas_src>

<mosaic_0001>
module attributes {stable_mosaic.version = 11 : i64} {
  func.func @_crelu_kernel(%arg0: i32, %arg1: i32, %arg2: memref<1x4x256xf32, #tpu.memory_space<vmem>>, %arg3: memref<1x2x4x256xf32, #tpu.memory_space<vmem>>) attributes {dimension_semantics = [#tpu.dimension_semantics<parallel>, #tpu.dimension_semantics<parallel>], iteration_bounds = array<i64: 2, 1>, scalar_prefetch = 0 : i64, scratch_operands = 0 : i64, tpu.core_type = #tpu.core_type<tc>, window_params = [{transform_indices = @transform_0, window_bounds = array<i64: 1, 4, 256>}, {transform_indices = @transform_1, window_bounds = array<i64: 1, 2, 4, 256>}]} {
    %c0 = arith.constant 0 : index
    %c0_0 = arith.constant 0 : index
    %c0_1 = arith.constant 0 : index
    %0 = vector.load %arg2[%c0, %c0_0, %c0_1] : memref<1x4x256xf32, #tpu.memory_space<vmem>>, vector<1x4x256xf32>
    %cst = arith.constant 0.000000e+00 : f32
    %1 = vector.broadcast %cst : f32 to vector<1x4x256xf32>
    %2 = arith.maximumf %0, %1 : vector<1x4x256xf32>
    %c0_2 = arith.constant 0 : index
    %c0_3 = arith.constant 0 : index
    %c0_4 = arith.constant 0 : index
    %c0_5 = arith.constant 0 : index
    %3 = vector.load %arg3[%c0_2, %c0_3, %c0_4, %c0_5] : memref<1x2x4x256xf32, #tpu.memory_space<vmem>>, vector<1x1x4x256xf32>
    %4 = vector.shape_cast %3 : vector<1x1x4x256xf32> to vector<1x4x256xf32>
    %5 = vector.shape_cast %2 : vector<1x4x256xf32> to vector<1x1x4x256xf32>
    tpu.vector_store %arg3[%c0_2, %c0_3, %c0_4, %c0_5], %5 {strides = array<i32>} : memref<1x2x4x256xf32, #tpu.memory_space<vmem>>, vector<1x1x4x256xf32>,
    %cst_6 = arith.constant 0.000000e+00 : f32
    %6 = vector.broadcast %cst_6 : f32 to vector<1x4x256xf32>
    %7 = arith.subf %6, %0 : vector<1x4x256xf32>
    %cst_7 = arith.constant 0.000000e+00 : f32
    %8 = vector.broadcast %cst_7 : f32 to vector<1x4x256xf32>
    %9 = arith.maximumf %7, %8 : vector<1x4x256xf32>
    %c0_8 = arith.constant 0 : index
    %c1 = arith.constant 1 : index
    %c0_9 = arith.constant 0 : index
    %c0_10 = arith.constant 0 : index
    %10 = vector.load %arg3[%c0_8, %c1, %c0_9, %c0_10] : memref<1x2x4x256xf32, #tpu.memory_space<vmem>>, vector<1x1x4x256xf32>
    %11 = vector.shape_cast %10 : vector<1x1x4x256xf32> to vector<1x4x256xf32>
    %12 = vector.shape_cast %9 : vector<1x4x256xf32> to vector<1x1x4x256xf32>
    tpu.vector_store %arg3[%c0_8, %c1, %c0_9, %c0_10], %12 {strides = array<i32>} : memref<1x2x4x256xf32, #tpu.memory_space<vmem>>, vector<1x1x4x256xf32>,
    return
  }
  func.func @transform_0(%arg0: i32, %arg1: i32) -> (i32, i32, i32) {
    %c0_i32 = arith.constant 0 : i32
    %c0_i32_0 = arith.constant 0 : i32
    return %arg0, %c0_i32, %arg1 : i32, i32, i32
  }
  func.func @transform_1(%arg0: i32, %arg1: i32) -> (i32, i32, i32, i32) {
    %c0_i32 = arith.constant 0 : i32
    %c0_i32_0 = arith.constant 0 : i32
    %c0_i32_1 = arith.constant 0 : i32
    return %arg0, %c0_i32, %c0_i32_0, %arg1 : i32, i32, i32, i32
  }
}

</mosaic_0001>

<bundles_post_ra>
// kernel: tpu_custom_call.1
= control target key start
LH: loop header
LB: loop body
LE: loop exit
PB: predicated region body
PF: predicated region fallthrough
CT: control target
= control target key end

     0   :  { %6 = vsyncpa [#allocation3], 0  ;;  %s596_s0 = inlined_call_operand.hbm [shape: f32[2,4,256], index: 0, kind: input, shape index: {}]   ;;  %s597_s1 = inlined_call_operand.hbm [shape: f32[2,2,4,256], index: 1, kind: output, shape index: {}]  }
   0x1   :  { %8 = vsyncpa [#allocation3 + $0x1], 0 }
   0x2   :  { %9 = vsyncpa [#allocation4], 0 }
   0x3   :  { %11 = vsyncpa [#allocation4 + $0x1], 0  ;;  %s475_s6 = smov 0   ;;  %s477_s7 = smov 0  }
   0x4   :  { %s479_s8 = smov 0   ;;  %s481_s9 = smov 0  }
   0x5   :  { %s483_s10 = smov 0   ;;  %s485_s11 = smov 0  }
   0x6 LB: > { %s267_s12 = sadd.s32 4294967295, %s461_s11   ;;  %s268_s13 = sadd.s32 4294967294, %s461_s11   ;;  %s461_s11 = sphi %s485_s11, %s17_s11   ;;  %s457_s10 = sphi %s483_s10, %s606_s10   ;;  %s453_s9 = sphi %s481_s9, %s605_s9   ;;  %s449_s8 = sphi %s479_s8, %s604_s8   ;;  %s445_s7 = sphi %s477_s7, %s603_s7   ;;  %s441_s6 = sphi %s475_s6, %s602_s6  }
   0x7   : > { %s29_s14 = sadd.s32 1, %s457_s10  ;;  %s38_s15 = sadd.s32 1, %s449_s8 }
   0x8   : > { %p31_p0 = scmp.ge.s32.totalorder %s29_s14, 2  ;;  %p45_p1 = scmp.ne.s32.totalorder %s449_s8, %s445_s7 }
   0x9   : > { %p46_p2 = scmp.eq.s32.totalorder %s461_s11, 0  ;;  %p51_p3 = scmp.ne.s32.totalorder %s445_s7, %s441_s6 }
   0xa   : > { %s608_s14 = smov (%p31_p0, %s29_s14), 0  ;;  %p52_p5 = scmp.eq.s32.totalorder %s267_s12, 0 }
   0xb   : > { %p516_p4 = por %p46_p2, %p45_p1  ;;  %s33_s17 = ssub.s32 %s457_s10, %s608_s14 }
   0xc   : > { %p77_p6 = scmp.eq.s32.totalorder %s267_s12, 1  ;;  %p36_p7 = scmp.eq.s32.totalorder %s33_s17, 0 }
   0xd   : > { %p522_p8 = por %p52_p5, %p51_p3  ;;  %p83_p10 = scmp.eq.s32.totalorder %s268_s13, 1 }
   0xe   : > { %p526_p9 = por %p77_p6, %p45_p1  ;;  %p270_p12 = scmp.ge.s32.totalorder %s461_s11, 2 }
   0xf   : > { %s531_s20 = scalar_select %p36_p7, %s449_s8, %s38_s15  }
  0x10   : > { %p533_p11 = por %p83_p10, %p51_p3  ;;  %p297_p13 = scmp.lt.s32.totalorder %s461_s11, 2 }
  0x11   : > { %s103_s22 = sand.u32 1, %s449_s8   ;;  %s283_s24 = sshll.u32 %s457_s10, 3 }
  0x12   : > { %s271_s23 = sshll.u32 %s103_s22, 3  ;;  %s114_s27 = scalar_lea.hbm %s596_s0, %s283_s24 }
  0x13   : > { %s107_s28 = scalar_lea.vmem [#allocation2], %s271_s23  ;;  %s116_s30 = sshll.u32 %s114_s27, 4  ;;  %s117_s30 = int_to_ptr.hbm [resolvable:$true] %s116_s30 }
  0x14   : > { %s118_s29 = sshll.u32 %s107_s28, 4  ;;  %p290_p0 = pnand %p297_p13, %p516_p4  ;;  %s119_s29 = int_to_ptr.vmem [resolvable:$true] %s118_s29 }
  0x15   : > { %p274_p1 = scmp.ge.s32.totalorder %s461_s11, 1  ;;  %p123_p2 = scmp.lt.s32.totalorder %s461_s11, 3 }
  0x16   : > { %s104_s2 = scalar_lea.sflag [#allocation3], %s103_s22 }
  0x17   : > { %292 = dma.hbm_to_vmem [thread:$0]  (!%p290_p0), %s117_s30, 128, %s119_s29, %s104_s2  }
  0x18   : > { %p124_p3 = pnand %p274_p1, %p123_p2 }
  0x19   : > { %s549_s3 = sand.u32 (!%p124_p3), 1, %s445_s7  }
  0x1a   : > { %127 = sbr.rel (%p124_p3) target bundleno = 48 (0x30), region = 24  ;;  %s275_s4 = sshll.u32 (!%p124_p3), %s549_s3, 3 }
  0x1b   : > { %s130_s5 = scalar_lea.sflag (!%p124_p3), [#allocation3], %s549_s3  ;;  %s133_s12 = scalar_lea.vmem (!%p124_p3), [#allocation2], %s275_s4 }
  0x1f   : > { %432 = dma.done.wait (%p522_p8), %s130_s5, 128  }
  0x20   : > { %434 = vsyncadd (%p522_p8), %s130_s5, 4294967168  ;;  %s276_s13 = sshll.u32 %s549_s3, 4  ;;  %s284_s15 = sshll.u32 %s453_s9, 4  ;;  %v155_v0 = vld [vmem:[%s133_s12] sm:$0xff] }
  0x21   : > { %s176_s22 = scalar_lea.hbm %s597_s1, %s284_s15  ;;  %s152_s23 = scalar_lea.vmem [#allocation5], %s276_s13  ;;  %v156_v1 = vmax.f32 %v155_v0, 0.0  ;;  %v158_v2 = vsub.f32 0.0, %v155_v0 }
  0x22   : > { %s177_s24 = sshll.u32 %s152_s23, 4  ;;  %s179_s25 = sshll.u32 %s176_s22, 4  ;;  %s178_s24 = int_to_ptr.vmem [resolvable:$true] %s177_s24  ;;  %s180_s25 = int_to_ptr.hbm [resolvable:$true] %s179_s25 }
  0x23   : > { %157 = vst [vmem:[%s152_s23] sm:$0xff] %v156_v1  ;;  %v159_v3 = vmax.f32 %v158_v2, 0.0  ;;  %s163_s18 = scalar_lea.sflag [#allocation4], %s549_s3  ;;  %s393_s26 = sshra.s32 %s180_s25, 4  ;;  %s394_s26 = int_to_ptr.hbm [resolvable:$true] %s393_s26 }
  0x24   : > { %s395_s9 = scalar_lea.hbm %s394_s26, 16  ;;  %s399_s29 = scalar_lea.hbm %s597_s1, 32 }
  0x25   : > { %277 = vst [vmem:[%s152_s23 + $0x8] sm:$0xff] %v159_v3  ;;  %p396_p4 = scmp.ne.s32.totalorder %s394_s26, %s395_s9  ;;  %p400_p7 = scmp.lt.s32.totalorder %s394_s26, %s597_s1 }
  0x26   : > { %p401_p8 = scmp.lt.s32.totalorder %s399_s29, %s395_s9 }
  0x27   : > { %p397_p5 = pnand %p396_p4, %p526_p9 }
  0x28   : > { %p402_p10 = por %p401_p8, %p400_p7 }
  0x29   : > { %p398_p6 = pneg %p397_p5 }
  0x2b   : > { %p403_p13 = pnand %p402_p10, %p398_p6 }
  0x2d   : > { %406 = shalt.err (!%p403_p13)
}
  0x2e   : > { %s463_s3 = smov 128   ;;  %s464_s4 = smov 8  }
  0x2f   : > { %287 = dma.vmem_to_hbm [thread:$0]  (%p526_p9), %s178_s24, 256, %s180_s25, %s163_s18, %s463_s3, %s463_s3, %s464_s4  }
  0x30 PF: > { %s194_s5 = sand.u32 1, %s441_s6   ;;  %p294_p0 = pnand %p270_p12, %p533_p11 }
  0x31   : > { %s195_s12 = scalar_lea.sflag [#allocation4], %s194_s5 }
  0x32   : > { %p295_p1 = pneg %p294_p0 }
  0x34   : > { %436 = dma.done.wait (%p295_p1), %s195_s12, 256  }
  0x35   : > { %438 = vsyncadd (%p295_p1), %s195_s12, 4294967040  ;;  %s17_s11 = sadd.s32 1, %s461_s11   ;;  %s602_s6 = smov %s445_s7 }
  0x36   : > { %p14_p2 = scmp.ge.s32.totalorder %s17_s11, 4   ;;  %s603_s7 = smov %s449_s8 }
  0x37   : > { %s604_s8 = smov %s531_s20  ;;  %s605_s9 = smov %s457_s10 }
  0x38   : > { %s606_s10 = smov %s608_s14  ;;  %16 = sbr.rel (!%p14_p2) target bundleno = 6 (0x6), region = 70 }
  0x3d   :  { %201 = vsyncpa [#allocation3], 1 }
  0x3e   :  { %203 = vsyncpa [#allocation3 + $0x1], 1 }
  0x3f   :  { %204 = vsyncpa [#allocation4], 1 }
  0x40   :  { %206 = vsyncpa [#allocation4 + $0x1], 1 }

</bundles_post_ra>
